<compile_context>
chip_gen: v6e
topology: v6e:2x2x1
jax: 0.10.0
libtpu: 0.0.40
codegen_flags: <defaults>
</compile_context>

<pallas_src>
import jax
import jax.numpy as jnp
from jax.experimental import pallas as pl
from jax.experimental.pallas import tpu as pltpu


def _round_up(x, m):
    return (x + m - 1) // m * m


# --------------------------------------------------------------------------------------
# Shared per-tile body: fused layer-1 matmul, split (per-network) layer-2 matmuls.
# --------------------------------------------------------------------------------------
def _forward_tile(obs_ref, w1_ref, b1_ref, w2t_ref, w2p_ref, b2t_ref, b2p_ref):
    # layer 1: obs @ [W1_target | W1_pred]  -> one MXU push for both networks
    h = jnp.dot(obs_ref[...], w1_ref[...], preferred_element_type=jnp.float32)
    h = jnp.maximum(h + b1_ref[...], 0.0)

    h_pad = w2t_ref.shape[0]                       # static, 128-aligned split point
    h_t = h[:, :h_pad].astype(w2t_ref.dtype)
    h_p = h[:, h_pad:].astype(w2p_ref.dtype)

    # layer 2: two H_pad-wide matmuls (no zero off-diagonal FLOPs, half the W2 storage)
    o_t = jnp.dot(h_t, w2t_ref[...], preferred_element_type=jnp.float32)
    o_p = jnp.dot(h_p, w2p_ref[...], preferred_element_type=jnp.float32)
    o_t = jnp.maximum(o_t + b2t_ref[...], 0.0)
    o_p = jnp.maximum(o_p + b2p_ref[...], 0.0)
    return o_t, o_p


def _rnd_feat_kernel(obs_ref, w1_ref, b1_ref, w2t_ref, w2p_ref, b2t_ref, b2p_ref,
                     feat_ref):
    """feat = [target_features | pred_features], one lane-dense (TB, 2*H_pad) slab."""
    o_t, o_p = _forward_tile(obs_ref, w1_ref, b1_ref, w2t_ref, w2p_ref, b2t_ref, b2p_ref)
    feat_ref[...] = jnp.concatenate([o_t, o_p], axis=-1).astype(feat_ref.dtype)


def _rnd_reward_kernel(obs_ref, w1_ref, b1_ref, w2t_ref, w2p_ref, b2t_ref, b2p_ref,
                       rew_ref):
    """rew = sum((target - pred)^2, axis=-1); features never touch HBM."""
    o_t, o_p = _forward_tile(obs_ref, w1_ref, b1_ref, w2t_ref, w2p_ref, b2t_ref, b2p_ref)
    diff = o_t - o_p                               # padded lanes are exactly 0
    rew_ref[...] = jnp.sum(diff * diff, axis=-1, keepdims=True)


# --------------------------------------------------------------------------------------
# Parameter packing: fuse layer-1, keep layer-2 per-network, zero-pad to (8,128) tiles.
# --------------------------------------------------------------------------------------
def pack_params(params, obs_dim, compute_dtype=jnp.bfloat16):
    H = params["wt2"].shape[1]
    D_pad = _round_up(obs_dim, 128)
    H_pad = _round_up(H, 128)

    w1 = jnp.zeros((D_pad, 2 * H_pad), jnp.float32)
    w1 = w1.at[:obs_dim, :H].set(params["wt1"])
    w1 = w1.at[:obs_dim, H_pad:H_pad + H].set(params["wp1"])

    b1 = jnp.zeros((1, 2 * H_pad), jnp.float32)
    b1 = b1.at[:, :H].set(params["bt1"])
    b1 = b1.at[:, H_pad:H_pad + H].set(params["bp1"])

    w2t = jnp.zeros((H_pad, H_pad), jnp.float32).at[:H, :H].set(params["wt2"])
    w2p = jnp.zeros((H_pad, H_pad), jnp.float32).at[:H, :H].set(params["wp2"])
    b2t = jnp.zeros((1, H_pad), jnp.float32).at[:, :H].set(params["bt2"])
    b2p = jnp.zeros((1, H_pad), jnp.float32).at[:, :H].set(params["bp2"])

    return dict(
        w1=w1.astype(compute_dtype),                    # MXU inputs in compute_dtype
        w2t=w2t.astype(compute_dtype),
        w2p=w2p.astype(compute_dtype),
        b1=b1, b2t=b2t, b2p=b2p,                        # biases stay f32 (post-accum add)
        obs_dim=obs_dim, hidden_dim=H, d_pad=D_pad, h_pad=H_pad,
        compute_dtype=compute_dtype,
    )


# --------------------------------------------------------------------------------------
# Pallas call wrapper (balanced batch tiles, resident weights, lane-dense outputs).
# --------------------------------------------------------------------------------------
def _rnd_call(obs, packed, *, want_features, batch_tile=1024):
    B, D = obs.shape
    D_pad, H_pad = packed["d_pad"], packed["h_pad"]
    cdt = packed["compute_dtype"]
    assert D == packed["obs_dim"]

    # balanced batch tiles: pad waste bounded by <8 rows per tile.
    B8 = _round_up(B, 8)
    num_tiles = pl.cdiv(B8, batch_tile)
    TB = _round_up(pl.cdiv(B8, num_tiles), 8)
    B_pad = num_tiles * TB

    # skip the wrapper-side pad copy when obs is already aligned.
    if (B, D) == (B_pad, D_pad) and obs.dtype == cdt:
        obs_p = obs
    elif (B, D) == (B_pad, D_pad):
        obs_p = obs.astype(cdt)
    else:
        obs_p = jnp.zeros((B_pad, D_pad), cdt).at[:B, :D].set(obs.astype(cdt))

    resident = lambda i: (0, 0)                    # weights/biases stay in VMEM
    in_specs = [
        pl.BlockSpec((TB, D_pad), lambda i: (i, 0)),       # obs tile (pipelined)
        pl.BlockSpec((D_pad, 2 * H_pad), resident),        # fused W1
        pl.BlockSpec((1, 2 * H_pad), resident),            # fused b1
        pl.BlockSpec((H_pad, H_pad), resident),            # W2 target
        pl.BlockSpec((H_pad, H_pad), resident),            # W2 predictor
        pl.BlockSpec((1, H_pad), resident),                # b2 target
        pl.BlockSpec((1, H_pad), resident),                # b2 predictor
    ]

    if want_features:
        kernel = _rnd_feat_kernel
        out_shape = jax.ShapeDtypeStruct((B_pad, 2 * H_pad), jnp.float32)
        out_specs = pl.BlockSpec((TB, 2 * H_pad), lambda i: (i, 0))
        out_tile_bytes = TB * 2 * H_pad * 4
    else:
        kernel = _rnd_reward_kernel
        out_shape = jax.ShapeDtypeStruct((B_pad, 1), jnp.float32)
        out_specs = pl.BlockSpec((TB, 1), lambda i: (i, 0))
        out_tile_bytes = TB * 128 * 4              # (TB,1) pads to 128 lanes in VMEM

    # rough VMEM footprint (double-buffered I/O tiles + resident weights + f32 temps);
    # only raise the scoped limit when the default would not fit.
    isz = jnp.dtype(cdt).itemsize
    est = (2 * TB * D_pad * isz
           + 2 * (D_pad * 2 * H_pad + 2 * H_pad * H_pad + 4 * H_pad) * isz
           + 2 * out_tile_bytes
           + 4 * TB * 2 * H_pad * 4)
    vmem_limit = None if est <= (32 << 20) else int(min(est * 5 // 4, 96 << 20))

    compiler_params = pltpu.CompilerParams(
        # TODO(synk): pltpu.CORE_PARALLEL / pl.core_map on v7x for guaranteed 2-TC split.
        dimension_semantics=("parallel",),
        vmem_limit_bytes=vmem_limit,
    )

    return pl.pallas_call(
        kernel,
        out_shape=out_shape,
        grid_spec=pltpu.PrefetchScalarGridSpec(
            num_scalar_prefetch=0,
            grid=(num_tiles,),
            in_specs=in_specs,
            out_specs=out_specs,
        ),
        compiler_params=compiler_params,
    )(obs_p, packed["w1"], packed["b1"], packed["w2t"], packed["w2p"],
      packed["b2t"], packed["b2p"])


def rnd_forward(obs, packed, *, batch_tile=1024):
    """Returns (target_feature, pred_feature), each (B, hidden_dim) float32."""
    B = obs.shape[0]
    H, H_pad = packed["hidden_dim"], packed["h_pad"]
    feat = _rnd_call(obs, packed, want_features=True, batch_tile=batch_tile)
    return feat[:B, :H], feat[:B, H_pad:H_pad + H]


def compute_rnd_intrinsic_reward(obs, packed, *, batch_tile=1024):
    """Returns (B,) float32 intrinsic rewards; feature maps never hit HBM."""
    B = obs.shape[0]
    rew = _rnd_call(obs, packed, want_features=False, batch_tile=batch_tile)
    return rew[:B, 0]


# --------------------------------------------------------------------------------------
# Init + pure-JAX reference (matches PyTorch nn.Linear default init / RNDNetwork forward).
# --------------------------------------------------------------------------------------
def init_params(key, obs_dim, hidden_dim):
    keys = jax.random.split(key, 8)

    def lin(kw, kb, fan_in, fan_out):
        bound = 1.0 / jnp.sqrt(fan_in)
        w = jax.random.uniform(kw, (fan_in, fan_out), jnp.float32, -bound, bound)
        b = jax.random.uniform(kb, (1, fan_out), jnp.float32, -bound, bound)
        return w, b

    wt1, bt1 = lin(keys[0], keys[1], obs_dim, hidden_dim)
    wt2, bt2 = lin(keys[2], keys[3], hidden_dim, hidden_dim)
    wp1, bp1 = lin(keys[4], keys[5], obs_dim, hidden_dim)
    wp2, bp2 = lin(keys[6], keys[7], obs_dim and hidden_dim, hidden_dim)
    return dict(wt1=wt1, bt1=bt1, wt2=wt2, bt2=bt2,
                wp1=wp1, bp1=bp1, wp2=wp2, bp2=bp2)


def rnd_forward_ref(obs, p):
    h_t = jnp.maximum(obs @ p["wt1"] + p["bt1"], 0.0)
    t = jnp.maximum(h_t @ p["wt2"] + p["bt2"], 0.0)
    h_p = jnp.maximum(obs @ p["wp1"] + p["bp1"], 0.0)
    pr = jnp.maximum(h_p @ p["wp2"] + p["bp2"], 0.0)
    return t, pr


if __name__ == "__main__":
    batch = 8
    obs_dim = 16
    hidden_dim = 32

    key = jax.random.PRNGKey(0)
    k_obs, k_params = jax.random.split(key)

    obs = jax.random.normal(k_obs, (batch, obs_dim), dtype=jnp.float32)
    params = init_params(k_params, obs_dim, hidden_dim)

    t_ref, p_ref = rnd_forward_ref(obs, params)
    rew_ref = jnp.sum((t_ref - p_ref) ** 2, axis=1)

    # ---- f32 compute path: exact parity with the PyTorch module numerics ----
    packed_f32 = pack_params(params, obs_dim, compute_dtype=jnp.float32)
    t_f32, p_f32 = rnd_forward(obs, packed_f32)
    rew_f32 = compute_rnd_intrinsic_reward(obs, packed_f32)
    jax.block_until_ready((t_f32, p_f32, rew_f32))
    assert t_f32.shape == (batch, hidden_dim) and p_f32.shape == (batch, hidden_dim)
    assert jnp.allclose(t_f32, t_ref, atol=1e-5, rtol=1e-5)
    assert jnp.allclose(p_f32, p_ref, atol=1e-5, rtol=1e-5)
    assert rew_f32.shape == (batch,)
    assert jnp.allclose(rew_f32, rew_ref, atol=1e-4, rtol=1e-5)

    # ---- default bf16-MXU path: f32 accumulation, looser tolerance ----
    packed_bf16 = pack_params(params, obs_dim)      # compute_dtype=bf16
    t_bf, p_bf = rnd_forward(obs, packed_bf16)
    rew_bf = compute_rnd_intrinsic_reward(obs, packed_bf16)
    jax.block_until_ready((t_bf, p_bf, rew_bf))
    assert jnp.allclose(t_bf, t_ref, atol=5e-2, rtol=5e-2)
    assert jnp.allclose(p_bf, p_ref, atol=5e-2, rtol=5e-2)
    assert jnp.allclose(rew_bf, rew_ref, atol=1.5e-1, rtol=1.5e-1)

    print("KERNEL_OK")
</pallas_src>

<mosaic_0001>
module attributes {stable_mosaic.version = 11 : i64} {
  func.func @_rnd_feat_kernel(%arg0: i32, %arg1: memref<8x128xf32, #tpu.memory_space<vmem>>, %arg2: memref<128x256xf32, #tpu.memory_space<vmem>>, %arg3: memref<1x256xf32, #tpu.memory_space<vmem>>, %arg4: memref<128x128xf32, #tpu.memory_space<vmem>>, %arg5: memref<128x128xf32, #tpu.memory_space<vmem>>, %arg6: memref<1x128xf32, #tpu.memory_space<vmem>>, %arg7: memref<1x128xf32, #tpu.memory_space<vmem>>, %arg8: memref<8x256xf32, #tpu.memory_space<vmem>>) attributes {dimension_semantics = [#tpu.dimension_semantics<parallel>], iteration_bounds = array<i64: 1>, scalar_prefetch = 0 : i64, scratch_operands = 0 : i64, tpu.core_type = #tpu.core_type<tc>, window_params = [{transform_indices = @transform_0, window_bounds = array<i64: 8, 128>}, {pipeline_mode = #tpu.pipeline_mode<synchronous>, transform_indices = @transform_1, window_bounds = array<i64: 128, 256>}, {pipeline_mode = #tpu.pipeline_mode<synchronous>, transform_indices = @transform_2, window_bounds = array<i64: 1, 256>}, {pipeline_mode = #tpu.pipeline_mode<synchronous>, transform_indices = @transform_3, window_bounds = array<i64: 128, 128>}, {pipeline_mode = #tpu.pipeline_mode<synchronous>, transform_indices = @transform_4, window_bounds = array<i64: 128, 128>}, {pipeline_mode = #tpu.pipeline_mode<synchronous>, transform_indices = @transform_5, window_bounds = array<i64: 1, 128>}, {pipeline_mode = #tpu.pipeline_mode<synchronous>, transform_indices = @transform_6, window_bounds = array<i64: 1, 128>}, {transform_indices = @transform_7, window_bounds = array<i64: 8, 256>}]} {
    %c0 = arith.constant 0 : index
    %c0_0 = arith.constant 0 : index
    %0 = vector.load %arg1[%c0, %c0_0] : memref<8x128xf32, #tpu.memory_space<vmem>>, vector<8x128xf32>
    %c0_1 = arith.constant 0 : index
    %c0_2 = arith.constant 0 : index
    %1 = vector.load %arg2[%c0_1, %c0_2] : memref<128x256xf32, #tpu.memory_space<vmem>>, vector<128x256xf32>
    %cst = arith.constant dense<0.000000e+00> : vector<8x256xf32>
    %2 = tpu.matmul %0, %1, %cst {dimension_numbers = #tpu.dot_dimension_numbers<[1], [0], [0], [1], [0, 0, 1, 1], [], []>} : vector<8x128xf32>, vector<128x256xf32>, vector<8x256xf32> -> vector<8x256xf32>
    %c0_3 = arith.constant 0 : index
    %c0_4 = arith.constant 0 : index
    %3 = vector.load %arg3[%c0_3, %c0_4] : memref<1x256xf32, #tpu.memory_space<vmem>>, vector<1x256xf32>
    %4 = vector.broadcast %3 : vector<1x256xf32> to vector<8x256xf32>
    %5 = arith.addf %2, %4 : vector<8x256xf32>
    %cst_5 = arith.constant 0.000000e+00 : f32
    %6 = vector.broadcast %cst_5 : f32 to vector<8x256xf32>
    %7 = arith.maximumf %5, %6 : vector<8x256xf32>
    %8 = vector.extract_strided_slice %7 {offsets = [0, 0], sizes = [8, 128], strides = [1, 1]} : vector<8x256xf32> to vector<8x128xf32>
    %9 = vector.extract_strided_slice %7 {offsets = [0, 128], sizes = [8, 128], strides = [1, 1]} : vector<8x256xf32> to vector<8x128xf32>
    %c0_6 = arith.constant 0 : index
    %c0_7 = arith.constant 0 : index
    %10 = vector.load %arg4[%c0_6, %c0_7] : memref<128x128xf32, #tpu.memory_space<vmem>>, vector<128x128xf32>
    %cst_8 = arith.constant dense<0.000000e+00> : vector<8x128xf32>
    %11 = tpu.matmul %8, %10, %cst_8 {dimension_numbers = #tpu.dot_dimension_numbers<[1], [0], [0], [1], [0, 0, 1, 1], [], []>} : vector<8x128xf32>, vector<128x128xf32>, vector<8x128xf32> -> vector<8x128xf32>
    %c0_9 = arith.constant 0 : index
    %c0_10 = arith.constant 0 : index
    %12 = vector.load %arg5[%c0_9, %c0_10] : memref<128x128xf32, #tpu.memory_space<vmem>>, vector<128x128xf32>
    %cst_11 = arith.constant dense<0.000000e+00> : vector<8x128xf32>
    %13 = tpu.matmul %9, %12, %cst_11 {dimension_numbers = #tpu.dot_dimension_numbers<[1], [0], [0], [1], [0, 0, 1, 1], [], []>} : vector<8x128xf32>, vector<128x128xf32>, vector<8x128xf32> -> vector<8x128xf32>
    %c0_12 = arith.constant 0 : index
    %c0_13 = arith.constant 0 : index
    %14 = vector.load %arg6[%c0_12, %c0_13] : memref<1x128xf32, #tpu.memory_space<vmem>>, vector<1x128xf32>
    %15 = vector.broadcast %14 : vector<1x128xf32> to vector<8x128xf32>
    %16 = arith.addf %11, %15 : vector<8x128xf32>
    %cst_14 = arith.constant 0.000000e+00 : f32
    %17 = vector.broadcast %cst_14 : f32 to vector<8x128xf32>
    %18 = arith.maximumf %16, %17 : vector<8x128xf32>
    %c0_15 = arith.constant 0 : index
    %c0_16 = arith.constant 0 : index
    %19 = vector.load %arg7[%c0_15, %c0_16] : memref<1x128xf32, #tpu.memory_space<vmem>>, vector<1x128xf32>
    %20 = vector.broadcast %19 : vector<1x128xf32> to vector<8x128xf32>
    %21 = arith.addf %13, %20 : vector<8x128xf32>
    %cst_17 = arith.constant 0.000000e+00 : f32
    %22 = vector.broadcast %cst_17 : f32 to vector<8x128xf32>
    %23 = arith.maximumf %21, %22 : vector<8x128xf32>
    %24 = tpu.concatenate %18, %23 in 1 : vector<8x128xf32>, vector<8x128xf32> -> vector<8x256xf32>
    %c0_18 = arith.constant 0 : index
    %c0_19 = arith.constant 0 : index
    %25 = vector.load %arg8[%c0_18, %c0_19] : memref<8x256xf32, #tpu.memory_space<vmem>>, vector<8x256xf32>
    tpu.vector_store %arg8[%c0_18, %c0_19], %24 {strides = array<i32>} : memref<8x256xf32, #tpu.memory_space<vmem>>, vector<8x256xf32>,
    return
  }
  func.func @transform_0(%arg0: i32) -> (i32, i32) {
    %c0_i32 = arith.constant 0 : i32
    %c0_i32_0 = arith.constant 0 : i32
    return %arg0, %c0_i32 : i32, i32
  }
  func.func @transform_1(%arg0: i32) -> (i32, i32) {
    %c0_i32 = arith.constant 0 : i32
    %c0_i32_0 = arith.constant 0 : i32
    %c0_i32_1 = arith.constant 0 : i32
    return %c0_i32, %c0_i32_0 : i32, i32
  }
  func.func @transform_2(%arg0: i32) -> (i32, i32) {
    %c0_i32 = arith.constant 0 : i32
    %c0_i32_0 = arith.constant 0 : i32
    %c0_i32_1 = arith.constant 0 : i32
    return %c0_i32, %c0_i32_0 : i32, i32
  }
  func.func @transform_3(%arg0: i32) -> (i32, i32) {
    %c0_i32 = arith.constant 0 : i32
    %c0_i32_0 = arith.constant 0 : i32
    %c0_i32_1 = arith.constant 0 : i32
    return %c0_i32, %c0_i32_0 : i32, i32
  }
  func.func @transform_4(%arg0: i32) -> (i32, i32) {
    %c0_i32 = arith.constant 0 : i32
    %c0_i32_0 = arith.constant 0 : i32
    %c0_i32_1 = arith.constant 0 : i32
    return %c0_i32, %c0_i32_0 : i32, i32
  }
  func.func @transform_5(%arg0: i32) -> (i32, i32) {
    %c0_i32 = arith.constant 0 : i32
    %c0_i32_0 = arith.constant 0 : i32
    %c0_i32_1 = arith.constant 0 : i32
    return %c0_i32, %c0_i32_0 : i32, i32
  }
  func.func @transform_6(%arg0: i32) -> (i32, i32) {
    %c0_i32 = arith.constant 0 : i32
    %c0_i32_0 = arith.constant 0 : i32
    %c0_i32_1 = arith.constant 0 : i32
    return %c0_i32, %c0_i32_0 : i32, i32
  }
  func.func @transform_7(%arg0: i32) -> (i32, i32) {
    %c0_i32 = arith.constant 0 : i32
    %c0_i32_0 = arith.constant 0 : i32
    return %arg0, %c0_i32 : i32, i32
  }
}

</mosaic_0001>

<bundles_post_ra>
// kernel: tpu_custom_call.1
= control target key start
LH: loop header
LB: loop body
LE: loop exit
PB: predicated region body
PF: predicated region fallthrough
CT: control target
= control target key end

     0   :  { %12 = vsyncpa [#allocation3], 0  ;;  %s740_s0 = inlined_call_operand.hbm [shape: f32[8,128], index: 0, kind: input, shape index: {}]   ;;  %s741_s1 = inlined_call_operand.hbm [shape: f32[128,256], index: 1, kind: input, shape index: {}]   ;;  %s742_s2 = inlined_call_operand.vmem [shape: f32[1,256], index: 2, kind: input, shape index: {}]   ;;  %s743_s3 = inlined_call_operand.hbm [shape: f32[128,128], index: 3, kind: input, shape index: {}]   ;;  %s744_s4 = inlined_call_operand.hbm [shape: f32[128,128], index: 4, kind: input, shape index: {}]   ;;  %s745_s5 = inlined_call_operand.vmem [shape: f32[1,128], index: 5, kind: input, shape index: {}]   ;;  %s746_s6 = inlined_call_operand.vmem [shape: f32[1,128], index: 6, kind: input, shape index: {}]   ;;  %s747_s7 = inlined_call_operand.hbm [shape: f32[8,256], index: 7, kind: output, shape index: {}]  }
   0x1   :  { %13 = vsyncpa [#allocation6], 0 }
   0x2   :  { %14 = vsyncpa [#allocation9], 0 }
   0x3   :  { %15 = vsyncpa [#allocation4], 0  ;;  %s630_s24 = smov [#allocation5]  }
   0x4   :  { %s31_s25 = sshll.u32 %s630_s24, 4  ;;  %s32_s25 = int_to_ptr.vmem [resolvable:$true] %s31_s25 }
   0x5   :  { %s530_s26 = scalar_lea.vmem %s32_s25, 4096  ;;  %p535_p1 = scmp.lt.s32.totalorder %s32_s25, %s32_s25 }
   0x6   :  { %p531_p0 = scmp.ne.s32.totalorder %s32_s25, %s530_s26  ;;  %p536_p2 = scmp.lt.s32.totalorder %s530_s26, %s530_s26 }
   0x8   :  { %p537_p3 = por %p536_p2, %p535_p1 }
   0xa   :  { %p538_p4 = pnand %p537_p3, %p531_p0 }
   0xc   :  { %541 = shalt.err (!%p538_p4)
}
   0xd   :  { %s631_s27 = smov 256   ;;  %s632_s28 = smov 16  }
   0xe   :  { %37 = dma.hbm_to_vmem [thread:$0]  %s741_s1, 4096, %s32_s25, [#allocation6], %s631_s27, %s631_s27, %s632_s28  }
   0xf   :  { %s633_s8 = smov [#allocation2]   ;;  %s634_s10 = smov [#allocation7]  }
  0x10   :  { %s22_s9 = sshll.u32 %s633_s8, 4  ;;  %s45_s11 = sshll.u32 %s634_s10, 4  ;;  %s23_s9 = int_to_ptr.vmem [resolvable:$true] %s22_s9  ;;  %s46_s11 = int_to_ptr.vmem [resolvable:$true] %s45_s11 }
  0x11   :  { %s550_s12 = scalar_lea.vmem %s23_s9, 128  ;;  %p555_p6 = scmp.lt.s32.totalorder %s23_s9, %s23_s9 }
  0x12   :  { %p551_p5 = scmp.ne.s32.totalorder %s23_s9, %s550_s12  ;;  %p556_p7 = scmp.lt.s32.totalorder %s550_s12, %s550_s12 }
  0x14   :  { %p557_p8 = por %p556_p7, %p555_p6 }
  0x16   :  { %p558_p9 = pnand %p557_p8, %p551_p5 }
  0x18   :  { %561 = shalt.err (!%p558_p9)
}
  0x19   :  { %25 = dma.hbm_to_vmem [thread:$0]  %s740_s0, 128, %s23_s9, [#allocation3]  }
  0x1a   :  { %s570_s15 = scalar_lea.vmem %s46_s11, 2048  ;;  %p575_p11 = scmp.lt.s32.totalorder %s46_s11, %s46_s11 }
  0x1b   :  { %p571_p10 = scmp.ne.s32.totalorder %s46_s11, %s570_s15  ;;  %p576_p12 = scmp.lt.s32.totalorder %s570_s15, %s570_s15 }
  0x1d   :  { %p577_p13 = por %p576_p12, %p575_p11 }
  0x1f   :  { %p578_p0 = pnand %p577_p13, %p571_p10 }
  0x21   :  { %581 = shalt.err (!%p578_p0)
}
  0x22   :  { %s635_s1 = smov 128   ;;  %s636_s16 = smov 8  }
  0x23   :  { %51 = dma.hbm_to_vmem [thread:$0]  %s743_s3, 2048, %s46_s11, [#allocation6], %s635_s1, %s635_s1, %s636_s16  }
  0x24   :  { %s637_s19 = smov [#allocation8]  }
  0x25   :  { %s57_s20 = sshll.u32 %s637_s19, 4  ;;  %s58_s20 = int_to_ptr.vmem [resolvable:$true] %s57_s20 }
  0x26   :  { %s590_s21 = scalar_lea.vmem %s58_s20, 2048  ;;  %p595_p2 = scmp.lt.s32.totalorder %s58_s20, %s58_s20 }
  0x27   :  { %p591_p1 = scmp.ne.s32.totalorder %s58_s20, %s590_s21  ;;  %p596_p3 = scmp.lt.s32.totalorder %s590_s21, %s590_s21 }
  0x29   :  { %p597_p4 = por %p596_p3, %p595_p2 }
  0x2b   :  { %p598_p5 = pnand %p597_p4, %p591_p1 }
  0x2d   :  { %601 = shalt.err (!%p598_p5)
}
  0x2e   :  { %63 = dma.hbm_to_vmem [thread:$0]  %s744_s4, 2048, %s58_s20, [#allocation9], %s635_s1, %s635_s1, %s636_s16  }
  0x2f   :  { %622 = dma.done.wait [#allocation3], 128  }
  0x30   :  { %623 = vsyncadd [#allocation3], 4294967168 }
  0x31   :  { %624 = dma.done.wait [#allocation6], 6144  }
  0x32   :  { %625 = vsyncadd [#allocation6], 4294961152 }
  0x33   :  { %626 = dma.done.wait [#allocation9], 2048  }
  0x34   :  { %627 = vsyncadd [#allocation9], 4294965248  ;;  %v638_v0 = vmov 0.0   ;;  %v112_v1 = vld [vmem:[#allocation5 + $0xf8] sm:$0xff]  ;;  %v111_v2 = vld [vmem:[#allocation5 + $0xf0] sm:$0xff]  ;;  %vm639_vm0 = vmmov 0  }
  0x35   :  { %189 = vmatprep.mubr.f32.mxu0 %v638_v0  ;;  %441 = vmatprep.subr.mxu1 %v638_v0  ;;  %v110_v3 = vld [vmem:[#allocation5 + $0xe8] sm:$0xff]  ;;  %v109_v4 = vld [vmem:[#allocation5 + $0xe0] sm:$0xff]  ;;  %v108_v5 = vld [vmem:[#allocation5 + $0xd8] sm:$0xff] }
  0x36   :  { %125 = vmatprep.subr.mxu0 %v112_v1  ;;  %v107_v6 = vld [vmem:[#allocation5 + $0xd0] sm:$0xff]  ;;  %v106_v7 = vld [vmem:[#allocation5 + $0xc8] sm:$0xff]  ;;  %v105_v8 = vld [vmem:[#allocation5 + $0xc0] sm:$0xff]  ;;  %473 = vmatprep.mubr.msk.f32.mxu1 %vm639_vm0, %v638_v0 }
  0x37   :  { %126 = vmatpush1.msra.mxu0 %v111_v2  ;;  %v104_v9 = vld [vmem:[#allocation5 + $0xb8] sm:$0xff]  ;;  %v103_v10 = vld [vmem:[#allocation5 + $0xb0] sm:$0xff]  ;;  %v102_v11 = vld [vmem:[#allocation5 + $0xa8] sm:$0xff] }
  0x38   :  { %127 = vmatprep.subr.mxu0 %v110_v3  ;;  %v101_v12 = vld [vmem:[#allocation5 + $0xa0] sm:$0xff]  ;;  %v100_v13 = vld [vmem:[#allocation5 + $0x98] sm:$0xff]  ;;  %v99_v14 = vld [vmem:[#allocation5 + $0x90] sm:$0xff]  ;;  %v115_v3 = vlaneseq }
  0x39   :  { %128 = vmatpush1.msra.mxu0 %v109_v4  ;;  %v213_v15 = vld [vmem:[#allocation7 + $0x78] sm:$0xff]  ;;  %v212_v16 = vld [vmem:[#allocation7 + $0x70] sm:$0xff]  ;;  %v98_v17 = vld [vmem:[#allocation5 + $0x88] sm:$0xff] }
  0x3a   :  { %129 = vmatprep.subr.mxu0 %v108_v5  ;;  %442 = vmatpush3.msra.mxu1 %v213_v15  ;;  %v97_v18 = vld [vmem:[#allocation5 + $0x80] sm:$0xff]  ;;  %v211_v19 = vld [vmem:[#allocation7 + $0x68] sm:$0xff]  ;;  %v96_v20 = vld [vmem:[#allocation5 + $0x78] sm:$0xff]  ;;  %v116_v4 = vshrl.u32 %v115_v3, 7 }
  0x3b   :  { %130 = vmatpush1.msra.mxu0 %v107_v6  ;;  %443 = vmatprep.subr.mxu1 %v638_v0  ;;  %v95_v21 = vld [vmem:[#allocation5 + $0x70] sm:$0xff]  ;;  %v210_v22 = vld [vmem:[#allocation7 + $0x60] sm:$0xff]  ;;  %v94_v23 = vld [vmem:[#allocation5 + $0x68] sm:$0xff] }
  0x3c   :  { %131 = vmatprep.subr.mxu0 %v106_v7  ;;  %444 = vmatpush3.msra.mxu1 %v212_v16  ;;  %v93_v24 = vld [vmem:[#allocation5 + $0x60] sm:$0xff]  ;;  %v209_v25 = vld [vmem:[#allocation7 + $0x58] sm:$0xff]  ;;  %v91_v27 = vld [vmem:[#allocation5 + $0x50] sm:$0xff]  ;;  %v117_v5 = vsub.s32 0, %v116_v4  ;;  %v121_v7 = vsub.s32 1, %v116_v4 }
  0x3d   :  { %132 = vmatpush1.msra.mxu0 %v105_v8  ;;  %445 = vmatprep.subr.mxu1 %v638_v0  ;;  %v92_v26 = vld [vmem:[#allocation5 + $0x58] sm:$0xff]  ;;  %v208_v28 = vld [vmem:[#allocation7 + $0x50] sm:$0xff]  ;;  %v90_v29 = vld [vmem:[#allocation5 + $0x48] sm:$0xff] }
  0x3e   :  { %133 = vmatprep.subr.mxu0 %v104_v9  ;;  %446 = vmatpush3.msra.mxu1 %v211_v19  ;;  %v89_v30 = vld [vmem:[#allocation5 + $0x40] sm:$0xff]  ;;  %v207_v31 = vld [vmem:[#allocation7 + $0x48] sm:$0xff]  ;;  %v88_v32 = vld [vmem:[#allocation5 + $0x38] sm:$0xff] }
  0x3f   :  { %134 = vmatpush1.msra.mxu0 %v103_v10  ;;  %447 = vmatprep.subr.mxu1 %v638_v0  ;;  %v87_v33 = vld [vmem:[#allocation5 + $0x30] sm:$0xff]  ;;  %v206_v34 = vld [vmem:[#allocation7 + $0x40] sm:$0xff]  ;;  %v86_v35 = vld [vmem:[#allocation5 + $0x28] sm:$0xff] }
  0x40   :  { %135 = vmatprep.subr.mxu0 %v102_v11  ;;  %448 = vmatpush3.msra.mxu1 %v210_v22  ;;  %v85_v36 = vld [vmem:[#allocation5 + $0x20] sm:$0xff]  ;;  %v205_v37 = vld [vmem:[#allocation7 + $0x38] sm:$0xff]  ;;  %v83_v39 = vld [vmem:[#allocation5 + $0x10] sm:$0xff] }
  0x41   :  { %136 = vmatpush1.msra.mxu0 %v101_v12  ;;  %449 = vmatprep.subr.mxu1 %v638_v0  ;;  %v84_v38 = vld [vmem:[#allocation5 + $0x18] sm:$0xff]  ;;  %v204_v40 = vld [vmem:[#allocation7 + $0x30] sm:$0xff]  ;;  %v82_v41 = vld [vmem:[#allocation5 + $0x8] sm:$0xff] }
  0x42   :  { %137 = vmatprep.subr.mxu0 %v100_v13  ;;  %450 = vmatpush3.msra.mxu1 %v209_v25  ;;  %v81_v42 = vld [vmem:[#allocation5] sm:$0xff]  ;;  %v203_v43 = vld [vmem:[#allocation7 + $0x28] sm:$0xff]  ;;  %v80_v44 = vld [vmem:[#allocation2] sm:$0xff] }
  0x43   :  { %138 = vmatpush1.msra.mxu0 %v99_v14  ;;  %451 = vmatprep.subr.mxu1 %v638_v0  ;;  %v229_v45 = vld [vmem:[#allocation8 + $0x78] sm:$0xff]  ;;  %v202_v46 = vld [vmem:[#allocation7 + $0x20] sm:$0xff]  ;;  %v228_v47 = vld [vmem:[#allocation8 + $0x70] sm:$0xff] }
  0x44   :  { %139 = vmatprep.subr.mxu0 %v98_v17  ;;  %452 = vmatpush3.msra.mxu1 %v208_v28  ;;  %v201_v48 = vld [vmem:[#allocation7 + $0x18] sm:$0xff]  ;;  %v227_v49 = vld [vmem:[#allocation8 + $0x68] sm:$0xff]  ;;  %v226_v50 = vld [vmem:[#allocation8 + $0x60] sm:$0xff] }
  0x45   :  { %140 = vmatpush1.msra.mxu0 %v97_v18  ;;  %453 = vmatprep.subr.mxu1 %v638_v0  ;;  %v225_v51 = vld [vmem:[#allocation8 + $0x58] sm:$0xff]  ;;  %v224_v52 = vld [vmem:[#allocation8 + $0x50] sm:$0xff]  ;;  %v223_v53 = vld [vmem:[#allocation8 + $0x48] sm:$0xff] }
  0x46   :  { %141 = vmatprep.subr.mxu0 %v96_v20  ;;  %454 = vmatpush3.msra.mxu1 %v207_v31  ;;  %v222_v54 = vld [vmem:[#allocation8 + $0x40] sm:$0xff]  ;;  %v221_v55 = vld [vmem:[#allocation8 + $0x38] sm:$0xff]  ;;  %v220_v56 = vld [vmem:[#allocation8 + $0x30] sm:$0xff] }
  0x47   :  { %142 = vmatpush1.msra.mxu0 %v95_v21  ;;  %455 = vmatprep.subr.mxu1 %v638_v0  ;;  %v219_v57 = vld [vmem:[#allocation8 + $0x28] sm:$0xff]  ;;  %v218_v58 = vld [vmem:[#allocation8 + $0x20] sm:$0xff]  ;;  %v200_v59 = vld [vmem:[#allocation7 + $0x10] sm:$0xff] }
  0x48   :  { %143 = vmatprep.subr.mxu0 %v94_v23  ;;  %456 = vmatpush3.msra.mxu1 %v206_v34  ;;  %v217_v60 = vld [vmem:[#allocation8 + $0x18] sm:$0xff]  ;;  %v199_v61 = vld [vmem:[#allocation7 + $0x8] sm:$0xff]  ;;  %v216_v62 = vld [vmem:[#allocation8 + $0x10] sm:$0xff] }
  0x49   :  { %144 = vmatpush1.msra.mxu0 %v93_v24  ;;  %457 = vmatprep.subr.mxu1 %v638_v0  ;;  %v198_v63 = vld [vmem:[#allocation7] sm:$0xff]  ;;  %v215_v1 = vld [vmem:[#allocation8 + $0x8] sm:$0xff]  ;;  %v113_v6 = vld [vmem:[%s742_s2] sm:$0x3]  ;;  %s640_s2 = smov [#allocation10]  }
  0x4a   :  { %145 = vmatprep.subr.mxu0 %v92_v26  ;;  %458 = vmatpush3.msra.mxu1 %v205_v37  ;;  %v214_v2 = vld [vmem:[#allocation8] sm:$0xff]  ;;  %v118_v8 = vrot.slane %v113_v6, %v117_v5  ;;  %v122_v9 = vrot.slane %v113_v6, %v121_v7  ;;  %v406_v17 = vld [vmem:[%s746_s6] ss:$0 sm:$0xff]  ;;  %s394_s27 = sshll.u32 %s640_s2, 4  ;;  %s395_s27 = int_to_ptr.vmem [resolvable:$true] %s394_s27 }
  0x4b   :  { %146 = vmatpush1.msra.mxu0 %v91_v27  ;;  %459 = vmatprep.subr.mxu1 %v638_v0  ;;  %s602_s28 = scalar_lea.vmem %s395_s27, 256  ;;  %p607_p7 = scmp.lt.s32.totalorder %s395_s27, %s395_s27 }
  0x4c   :  { %147 = vmatprep.subr.mxu0 %v90_v29  ;;  %460 = vmatpush3.msra.mxu1 %v204_v40  ;;  %p603_p6 = scmp.ne.s32.totalorder %s395_s27, %s602_s28  ;;  %p608_p8 = scmp.lt.s32.totalorder %s602_s28, %s602_s28 }
  0x4d   :  { %148 = vmatpush1.msra.mxu0 %v89_v30  ;;  %461 = vmatprep.subr.mxu1 %v638_v0 }
  0x4e   :  { %149 = vmatprep.subr.mxu0 %v88_v32  ;;  %462 = vmatpush3.msra.mxu1 %v203_v43  ;;  %p609_p9 = por %p608_p8, %p607_p7 }
  0x4f   :  { %150 = vmatpush1.msra.mxu0 %v87_v33  ;;  %463 = vmatprep.subr.mxu1 %v638_v0 }
  0x50   :  { %151 = vmatprep.subr.mxu0 %v86_v35  ;;  %464 = vmatpush3.msra.mxu1 %v202_v46  ;;  %p610_p10 = pnand %p609_p9, %p603_p6 }
  0x51   :  { %152 = vmatpush1.msra.mxu0 %v85_v36  ;;  %465 = vmatprep.subr.mxu1 %v638_v0 }
  0x52   :  { %153 = vmatprep.subr.mxu0 %v84_v38  ;;  %466 = vmatpush3.msra.mxu1 %v201_v48 }
  0x53   :  { %154 = vmatpush1.msra.mxu0 %v83_v39  ;;  %467 = vmatprep.subr.mxu1 %v638_v0 }
  0x54   :  { %155 = vmatprep.subr.mxu0 %v82_v41  ;;  %468 = vmatpush3.msra.mxu1 %v200_v59 }
  0x55   :  { %156 = vmatpush1.msra.mxu0 %v81_v42  ;;  %469 = vmatprep.subr.mxu1 %v638_v0 }
  0x56   :  { %190 = vmatmul.mubr.f32.vlgmr.msra.gmra.mxu0 %v80_v44  ;;  %476 = vmatprep.subr.mxu0 %v638_v0 }
  0x57   :  { %477 = vmatpush3.msra.mxu0 %v229_v45  ;;  %470 = vmatpush3.msra.mxu1 %v199_v61 }
  0x58   :  { %478 = vmatprep.subr.mxu0 %v638_v0  ;;  %471 = vmatprep.subr.mxu1 %v638_v0 }
  0x59   :  { %479 = vmatpush3.msra.mxu0 %v228_v47  ;;  %472 = vmatpush3.msra.mxu1 %v198_v63 }
  0x5a   :  { %480 = vmatprep.subr.mxu0 %v638_v0  ;;  %508 = vmatprep.mubr.msk.f32.mxu0 %vm639_vm0, %v638_v0 }
  0x5b   :  { %481 = vmatpush3.msra.mxu0 %v227_v49 }
  0x5c   :  { %482 = vmatprep.subr.mxu0 %v638_v0 }
  0x5d   :  { %483 = vmatpush3.msra.mxu0 %v226_v50 }
  0x5e   :  { %484 = vmatprep.subr.mxu0 %v638_v0 }
  0x5f   :  { %485 = vmatpush3.msra.mxu0 %v225_v51 }
  0x60   :  { %486 = vmatprep.subr.mxu0 %v638_v0 }
  0x61   :  { %487 = vmatpush3.msra.mxu0 %v224_v52 }
  0x62   :  { %488 = vmatprep.subr.mxu0 %v638_v0 }
  0x63   :  { %489 = vmatpush3.msra.mxu0 %v223_v53 }
  0x64   :  { %490 = vmatprep.subr.mxu0 %v638_v0 }
  0x65   :  { %491 = vmatpush3.msra.mxu0 %v222_v54 }
  0x66   :  { %492 = vmatprep.subr.mxu0 %v638_v0 }
  0x67   :  { %493 = vmatpush3.msra.mxu0 %v221_v55 }
  0x68   :  { %494 = vmatprep.subr.mxu0 %v638_v0 }
  0x69   :  { %495 = vmatpush3.msra.mxu0 %v220_v56 }
  0x6a   :  { %496 = vmatprep.subr.mxu0 %v638_v0 }
  0x6b   :  { %497 = vmatpush3.msra.mxu0 %v219_v57 }
  0x6c   :  { %498 = vmatprep.subr.mxu0 %v638_v0 }
  0x6d   :  { %499 = vmatpush3.msra.mxu0 %v218_v58 }
  0x6e   :  { %500 = vmatprep.subr.mxu0 %v638_v0 }
  0x6f   :  { %501 = vmatpush3.msra.mxu0 %v217_v60 }
  0x70   :  { %502 = vmatprep.subr.mxu0 %v638_v0 }
  0x71   :  { %503 = vmatpush3.msra.mxu0 %v216_v62 }
  0x72   :  { %504 = vmatprep.subr.mxu0 %v638_v0 }
  0x73   :  { %505 = vmatpush3.msra.mxu0 %v215_v1 }
  0x74   :  { %506 = vmatprep.subr.mxu0 %v638_v0  ;;  %v405_v0 = vld [vmem:[%s745_s5] ss:$0 sm:$0xff] }
  0x75   :  { %507 = vmatpush3.msra.mxu0 %v214_v2 }
 0x116   :  { %v191_v10 = vpop.f32.mrf.mxu0 }
 0x117   :  { %v192_v11 = vadd.f32 %v191_v10, %v118_v8 }
 0x118   :  { %v193_v12 = vpop.f32.mrf.mxu0 }
 0x119   :  { %v196_v13 = vmax.f32 %v192_v11, 0.0  ;;  %v194_v14 = vadd.f32 %v193_v12, %v122_v9 }
 0x11b   :  { %v197_v15 = vmax.f32 %v194_v14, 0.0  ;;  %474 = vmatmul.mubr.f32.vlgmr.msra.gmra.mxu1 %v196_v13 }
 0x11d   :  { %509 = vmatmul.mubr.f32.vlgmr.msra.gmra.mxu0 %v197_v15 }
 0x1db   :  { %v303_v16 = vpop.f32.mrf.mxu1 }
 0x1dc   :  { %v304_v18 = vadd.f32 %v405_v0, %v303_v16 }
 0x1dd   :  { %v475_v19 = vpop.f32.mrf.mxu1  ;;  %v381_v20 = vpop.f32.mrf.mxu0 }
 0x1de   :  { %v307_v21 = vmax.f32 %v304_v18, 0.0  ;;  %v382_v22 = vadd.f32 %v406_v17, %v381_v20 }
 0x1df   :  { %v510_v23 = vpop.f32.mrf.mxu0 }
 0x1e0   :  { %386 = vst [vmem:[#allocation10] sm:$0xff] %v307_v21  ;;  %v385_v24 = vmax.f32 %v382_v22, 0.0 }
 0x1e2   :  { %387 = vst [vmem:[#allocation10 + $0x8] sm:$0xff] %v385_v24 }
 0x1e3   :  { %613 = shalt.err (!%p610_p10)
}
 0x1e4   :  { %397 = dma.vmem_to_hbm [thread:$0]  %s395_s27, 256, %s747_s7, [#allocation4]  }
 0x1e5   :  { %628 = dma.done.wait [#allocation4], 256  }
 0x1e6   :  { %629 = vsyncadd [#allocation4], 4294967040 }
 0x1e7   :  { %401 = vsyncpa [#allocation3], 1 }
 0x1e8   :  { %402 = vsyncpa [#allocation6], 1 }
 0x1e9   :  { %403 = vsyncpa [#allocation9], 1 }
 0x1ea   :  { %404 = vsyncpa [#allocation4], 1 }

</bundles_post_ra>
